<compile_context>
chip_gen: v6e
topology: v6e:2x2x1
jax: 0.10.0
libtpu: 0.0.40
codegen_flags: <defaults>
</compile_context>

<pallas_src>
import jax
import jax.numpy as jnp
from jax.experimental import pallas as pl
from jax.experimental.pallas import tpu as pltpu

B = 2          # batch
S = 8          # sequence length
E = 128        # emb_size (multiple of 128 -> lane-aligned gather/placement)
MAX_LEN = 16   # max_len


def pos_enc_kernel(ts_ref, table_ref, emb_ref, out_ref, pos_ref):
    # ts_ref:    (B, S)        int32  SMEM   -- scalar reads drive the gather
    # table_ref: (MAX_LEN, E)  f32    VMEM   -- untiled positional table
    # emb_ref:   (B, S*E)      f32    VMEM   -- lane-dense view of emb_vec
    # out_ref:   (B, S*E)      f32    VMEM   -- HBM buffer aliased with emb input
    # pos_ref:   (B, S*E)      f32    VMEM scratch -- gathered rows (fully overwritten)
    n_b, n_s = ts_ref.shape
    _, n_e = table_ref.shape

    # Direct row gather: pos[b, s*E:(s+1)*E] = pos_table[timesteps[b, s], :]
    # Dynamic first-axis index into the table, static 128-aligned placement
    # into the (B, S*E) slab.
    for b in range(n_b):
        for s in range(n_s):
            t = ts_ref[b, s]                                   # SMEM scalar read
            pos_ref[b : b + 1, s * n_e : (s + 1) * n_e] = table_ref[pl.ds(t, 1), :]

    # Every element of pos_ref was written above; one lane-dense store.
    out_ref[...] = (pos_ref[...] + emb_ref[...]).astype(out_ref.dtype)


def simple_positional_encoding(emb_vec, timesteps, pos_table):
    """emb_vec: (B, S, E) f32, timesteps: (B, S) int32, pos_table: (MAX_LEN, E) f32."""
    b, s, e = emb_vec.shape
    assert e % 128 == 0, "emb_size must be a multiple of 128 for the lane-aligned path"

    emb2d = emb_vec.reshape(b, s * e)   # lane-dense (last dim a multiple of 128)

    smem = pl.BlockSpec(memory_space=pltpu.MemorySpace.SMEM)
    vmem = pl.BlockSpec(memory_space=pltpu.MemorySpace.VMEM)
    out2d = pl.pallas_call(
        pos_enc_kernel,
        out_shape=jax.ShapeDtypeStruct((b, s * e), emb_vec.dtype),
        in_specs=[smem, vmem, vmem],                    # ts->SMEM, table/emb->VMEM, single step
        out_specs=vmem,
        scratch_shapes=[pltpu.VMEM((b, s * e), pos_table.dtype)],
        input_output_aliases={2: 0},                    # reuse emb2d's HBM buffer for the output
    )(timesteps, pos_table, emb2d)
    return out2d.reshape(b, s, e)


if __name__ == "__main__":
    key = jax.random.PRNGKey(0)
    k_table, k_emb, k_ts = jax.random.split(key, 3)

    # nn.Embedding default init: N(0, 1)
    pos_table = jax.random.normal(k_table, (MAX_LEN, E), dtype=jnp.float32)
    emb_vec = jax.random.normal(k_emb, (B, S, E), dtype=jnp.float32)
    timesteps = jax.random.randint(k_ts, (B, S), 0, MAX_LEN, dtype=jnp.int32)

    # Reference (plain JAX), computed before the kernel call (the kernel wrapper
    # donates its internal lane-dense copy of emb via input_output_aliases).
    ref = jnp.take(pos_table, timesteps, axis=0) + emb_vec
    ref = jax.block_until_ready(ref)

    out = simple_positional_encoding(emb_vec, timesteps, pos_table)
    out = jax.block_until_ready(out)

    assert out.shape == (B, S, E)
    assert jnp.allclose(out, ref, atol=1e-5, rtol=1e-5)

    print("KERNEL_OK")
</pallas_src>

<mosaic_0001>
module attributes {stable_mosaic.version = 11 : i64} {
  func.func @pos_enc_kernel(%arg0: memref<2x8xi32, #tpu.memory_space<smem>>, %arg1: memref<16x128xf32, #tpu.memory_space<vmem>>, %arg2: memref<2x1024xf32, #tpu.memory_space<vmem>>, %arg3: memref<2x1024xf32, #tpu.memory_space<vmem>>, %arg4: memref<2x1024xf32, #tpu.memory_space<vmem>>) attributes {dimension_semantics = [], scalar_prefetch = 0 : i64, scratch_operands = 1 : i64, tpu.core_type = #tpu.core_type<tc>} {
    %c0 = arith.constant 0 : index
    %c0_0 = arith.constant 0 : index
    %0 = memref.load %arg0[%c0, %c0_0] : memref<2x8xi32, #tpu.memory_space<smem>>
    %1 = arith.index_cast %0 : i32 to index
    %c0_1 = arith.constant 0 : index
    %2 = vector.load %arg1[%1, %c0_1] : memref<16x128xf32, #tpu.memory_space<vmem>>, vector<1x128xf32>
    %c0_2 = arith.constant 0 : index
    %c0_3 = arith.constant 0 : index
    %3 = vector.load %arg4[%c0_2, %c0_3] : memref<2x1024xf32, #tpu.memory_space<vmem>>, vector<1x128xf32>
    tpu.vector_store %arg4[%c0_2, %c0_3], %2 {strides = array<i32>} : memref<2x1024xf32, #tpu.memory_space<vmem>>, vector<1x128xf32>,
    %c0_4 = arith.constant 0 : index
    %c1 = arith.constant 1 : index
    %4 = memref.load %arg0[%c0_4, %c1] : memref<2x8xi32, #tpu.memory_space<smem>>
    %5 = arith.index_cast %4 : i32 to index
    %c0_5 = arith.constant 0 : index
    %6 = vector.load %arg1[%5, %c0_5] : memref<16x128xf32, #tpu.memory_space<vmem>>, vector<1x128xf32>
    %c0_6 = arith.constant 0 : index
    %c128 = arith.constant 128 : index
    %7 = vector.load %arg4[%c0_6, %c128] : memref<2x1024xf32, #tpu.memory_space<vmem>>, vector<1x128xf32>
    tpu.vector_store %arg4[%c0_6, %c128], %6 {strides = array<i32>} : memref<2x1024xf32, #tpu.memory_space<vmem>>, vector<1x128xf32>,
    %c0_7 = arith.constant 0 : index
    %c2 = arith.constant 2 : index
    %8 = memref.load %arg0[%c0_7, %c2] : memref<2x8xi32, #tpu.memory_space<smem>>
    %9 = arith.index_cast %8 : i32 to index
    %c0_8 = arith.constant 0 : index
    %10 = vector.load %arg1[%9, %c0_8] : memref<16x128xf32, #tpu.memory_space<vmem>>, vector<1x128xf32>
    %c0_9 = arith.constant 0 : index
    %c256 = arith.constant 256 : index
    %11 = vector.load %arg4[%c0_9, %c256] : memref<2x1024xf32, #tpu.memory_space<vmem>>, vector<1x128xf32>
    tpu.vector_store %arg4[%c0_9, %c256], %10 {strides = array<i32>} : memref<2x1024xf32, #tpu.memory_space<vmem>>, vector<1x128xf32>,
    %c0_10 = arith.constant 0 : index
    %c3 = arith.constant 3 : index
    %12 = memref.load %arg0[%c0_10, %c3] : memref<2x8xi32, #tpu.memory_space<smem>>
    %13 = arith.index_cast %12 : i32 to index
    %c0_11 = arith.constant 0 : index
    %14 = vector.load %arg1[%13, %c0_11] : memref<16x128xf32, #tpu.memory_space<vmem>>, vector<1x128xf32>
    %c0_12 = arith.constant 0 : index
    %c384 = arith.constant 384 : index
    %15 = vector.load %arg4[%c0_12, %c384] : memref<2x1024xf32, #tpu.memory_space<vmem>>, vector<1x128xf32>
    tpu.vector_store %arg4[%c0_12, %c384], %14 {strides = array<i32>} : memref<2x1024xf32, #tpu.memory_space<vmem>>, vector<1x128xf32>,
    %c0_13 = arith.constant 0 : index
    %c4 = arith.constant 4 : index
    %16 = memref.load %arg0[%c0_13, %c4] : memref<2x8xi32, #tpu.memory_space<smem>>
    %17 = arith.index_cast %16 : i32 to index
    %c0_14 = arith.constant 0 : index
    %18 = vector.load %arg1[%17, %c0_14] : memref<16x128xf32, #tpu.memory_space<vmem>>, vector<1x128xf32>
    %c0_15 = arith.constant 0 : index
    %c512 = arith.constant 512 : index
    %19 = vector.load %arg4[%c0_15, %c512] : memref<2x1024xf32, #tpu.memory_space<vmem>>, vector<1x128xf32>
    tpu.vector_store %arg4[%c0_15, %c512], %18 {strides = array<i32>} : memref<2x1024xf32, #tpu.memory_space<vmem>>, vector<1x128xf32>,
    %c0_16 = arith.constant 0 : index
    %c5 = arith.constant 5 : index
    %20 = memref.load %arg0[%c0_16, %c5] : memref<2x8xi32, #tpu.memory_space<smem>>
    %21 = arith.index_cast %20 : i32 to index
    %c0_17 = arith.constant 0 : index
    %22 = vector.load %arg1[%21, %c0_17] : memref<16x128xf32, #tpu.memory_space<vmem>>, vector<1x128xf32>
    %c0_18 = arith.constant 0 : index
    %c640 = arith.constant 640 : index
    %23 = vector.load %arg4[%c0_18, %c640] : memref<2x1024xf32, #tpu.memory_space<vmem>>, vector<1x128xf32>
    tpu.vector_store %arg4[%c0_18, %c640], %22 {strides = array<i32>} : memref<2x1024xf32, #tpu.memory_space<vmem>>, vector<1x128xf32>,
    %c0_19 = arith.constant 0 : index
    %c6 = arith.constant 6 : index
    %24 = memref.load %arg0[%c0_19, %c6] : memref<2x8xi32, #tpu.memory_space<smem>>
    %25 = arith.index_cast %24 : i32 to index
    %c0_20 = arith.constant 0 : index
    %26 = vector.load %arg1[%25, %c0_20] : memref<16x128xf32, #tpu.memory_space<vmem>>, vector<1x128xf32>
    %c0_21 = arith.constant 0 : index
    %c768 = arith.constant 768 : index
    %27 = vector.load %arg4[%c0_21, %c768] : memref<2x1024xf32, #tpu.memory_space<vmem>>, vector<1x128xf32>
    tpu.vector_store %arg4[%c0_21, %c768], %26 {strides = array<i32>} : memref<2x1024xf32, #tpu.memory_space<vmem>>, vector<1x128xf32>,
    %c0_22 = arith.constant 0 : index
    %c7 = arith.constant 7 : index
    %28 = memref.load %arg0[%c0_22, %c7] : memref<2x8xi32, #tpu.memory_space<smem>>
    %29 = arith.index_cast %28 : i32 to index
    %c0_23 = arith.constant 0 : index
    %30 = vector.load %arg1[%29, %c0_23] : memref<16x128xf32, #tpu.memory_space<vmem>>, vector<1x128xf32>
    %c0_24 = arith.constant 0 : index
    %c896 = arith.constant 896 : index
    %31 = vector.load %arg4[%c0_24, %c896] : memref<2x1024xf32, #tpu.memory_space<vmem>>, vector<1x128xf32>
    tpu.vector_store %arg4[%c0_24, %c896], %30 {strides = array<i32>} : memref<2x1024xf32, #tpu.memory_space<vmem>>, vector<1x128xf32>,
    %c1_25 = arith.constant 1 : index
    %c0_26 = arith.constant 0 : index
    %32 = memref.load %arg0[%c1_25, %c0_26] : memref<2x8xi32, #tpu.memory_space<smem>>
    %33 = arith.index_cast %32 : i32 to index
    %c0_27 = arith.constant 0 : index
    %34 = vector.load %arg1[%33, %c0_27] : memref<16x128xf32, #tpu.memory_space<vmem>>, vector<1x128xf32>
    %c1_28 = arith.constant 1 : index
    %c0_29 = arith.constant 0 : index
    %35 = vector.load %arg4[%c1_28, %c0_29] : memref<2x1024xf32, #tpu.memory_space<vmem>>, vector<1x128xf32>
    tpu.vector_store %arg4[%c1_28, %c0_29], %34 {strides = array<i32>} : memref<2x1024xf32, #tpu.memory_space<vmem>>, vector<1x128xf32>,
    %c1_30 = arith.constant 1 : index
    %c1_31 = arith.constant 1 : index
    %36 = memref.load %arg0[%c1_30, %c1_31] : memref<2x8xi32, #tpu.memory_space<smem>>
    %37 = arith.index_cast %36 : i32 to index
    %c0_32 = arith.constant 0 : index
    %38 = vector.load %arg1[%37, %c0_32] : memref<16x128xf32, #tpu.memory_space<vmem>>, vector<1x128xf32>
    %c1_33 = arith.constant 1 : index
    %c128_34 = arith.constant 128 : index
    %39 = vector.load %arg4[%c1_33, %c128_34] : memref<2x1024xf32, #tpu.memory_space<vmem>>, vector<1x128xf32>
    tpu.vector_store %arg4[%c1_33, %c128_34], %38 {strides = array<i32>} : memref<2x1024xf32, #tpu.memory_space<vmem>>, vector<1x128xf32>,
    %c1_35 = arith.constant 1 : index
    %c2_36 = arith.constant 2 : index
    %40 = memref.load %arg0[%c1_35, %c2_36] : memref<2x8xi32, #tpu.memory_space<smem>>
    %41 = arith.index_cast %40 : i32 to index
    %c0_37 = arith.constant 0 : index
    %42 = vector.load %arg1[%41, %c0_37] : memref<16x128xf32, #tpu.memory_space<vmem>>, vector<1x128xf32>
    %c1_38 = arith.constant 1 : index
    %c256_39 = arith.constant 256 : index
    %43 = vector.load %arg4[%c1_38, %c256_39] : memref<2x1024xf32, #tpu.memory_space<vmem>>, vector<1x128xf32>
    tpu.vector_store %arg4[%c1_38, %c256_39], %42 {strides = array<i32>} : memref<2x1024xf32, #tpu.memory_space<vmem>>, vector<1x128xf32>,
    %c1_40 = arith.constant 1 : index
    %c3_41 = arith.constant 3 : index
    %44 = memref.load %arg0[%c1_40, %c3_41] : memref<2x8xi32, #tpu.memory_space<smem>>
    %45 = arith.index_cast %44 : i32 to index
    %c0_42 = arith.constant 0 : index
    %46 = vector.load %arg1[%45, %c0_42] : memref<16x128xf32, #tpu.memory_space<vmem>>, vector<1x128xf32>
    %c1_43 = arith.constant 1 : index
    %c384_44 = arith.constant 384 : index
    %47 = vector.load %arg4[%c1_43, %c384_44] : memref<2x1024xf32, #tpu.memory_space<vmem>>, vector<1x128xf32>
    tpu.vector_store %arg4[%c1_43, %c384_44], %46 {strides = array<i32>} : memref<2x1024xf32, #tpu.memory_space<vmem>>, vector<1x128xf32>,
    %c1_45 = arith.constant 1 : index
    %c4_46 = arith.constant 4 : index
    %48 = memref.load %arg0[%c1_45, %c4_46] : memref<2x8xi32, #tpu.memory_space<smem>>
    %49 = arith.index_cast %48 : i32 to index
    %c0_47 = arith.constant 0 : index
    %50 = vector.load %arg1[%49, %c0_47] : memref<16x128xf32, #tpu.memory_space<vmem>>, vector<1x128xf32>
    %c1_48 = arith.constant 1 : index
    %c512_49 = arith.constant 512 : index
    %51 = vector.load %arg4[%c1_48, %c512_49] : memref<2x1024xf32, #tpu.memory_space<vmem>>, vector<1x128xf32>
    tpu.vector_store %arg4[%c1_48, %c512_49], %50 {strides = array<i32>} : memref<2x1024xf32, #tpu.memory_space<vmem>>, vector<1x128xf32>,
    %c1_50 = arith.constant 1 : index
    %c5_51 = arith.constant 5 : index
    %52 = memref.load %arg0[%c1_50, %c5_51] : memref<2x8xi32, #tpu.memory_space<smem>>
    %53 = arith.index_cast %52 : i32 to index
    %c0_52 = arith.constant 0 : index
    %54 = vector.load %arg1[%53, %c0_52] : memref<16x128xf32, #tpu.memory_space<vmem>>, vector<1x128xf32>
    %c1_53 = arith.constant 1 : index
    %c640_54 = arith.constant 640 : index
    %55 = vector.load %arg4[%c1_53, %c640_54] : memref<2x1024xf32, #tpu.memory_space<vmem>>, vector<1x128xf32>
    tpu.vector_store %arg4[%c1_53, %c640_54], %54 {strides = array<i32>} : memref<2x1024xf32, #tpu.memory_space<vmem>>, vector<1x128xf32>,
    %c1_55 = arith.constant 1 : index
    %c6_56 = arith.constant 6 : index
    %56 = memref.load %arg0[%c1_55, %c6_56] : memref<2x8xi32, #tpu.memory_space<smem>>
    %57 = arith.index_cast %56 : i32 to index
    %c0_57 = arith.constant 0 : index
    %58 = vector.load %arg1[%57, %c0_57] : memref<16x128xf32, #tpu.memory_space<vmem>>, vector<1x128xf32>
    %c1_58 = arith.constant 1 : index
    %c768_59 = arith.constant 768 : index
    %59 = vector.load %arg4[%c1_58, %c768_59] : memref<2x1024xf32, #tpu.memory_space<vmem>>, vector<1x128xf32>
    tpu.vector_store %arg4[%c1_58, %c768_59], %58 {strides = array<i32>} : memref<2x1024xf32, #tpu.memory_space<vmem>>, vector<1x128xf32>,
    %c1_60 = arith.constant 1 : index
    %c7_61 = arith.constant 7 : index
    %60 = memref.load %arg0[%c1_60, %c7_61] : memref<2x8xi32, #tpu.memory_space<smem>>
    %61 = arith.index_cast %60 : i32 to index
    %c0_62 = arith.constant 0 : index
    %62 = vector.load %arg1[%61, %c0_62] : memref<16x128xf32, #tpu.memory_space<vmem>>, vector<1x128xf32>
    %c1_63 = arith.constant 1 : index
    %c896_64 = arith.constant 896 : index
    %63 = vector.load %arg4[%c1_63, %c896_64] : memref<2x1024xf32, #tpu.memory_space<vmem>>, vector<1x128xf32>
    tpu.vector_store %arg4[%c1_63, %c896_64], %62 {strides = array<i32>} : memref<2x1024xf32, #tpu.memory_space<vmem>>, vector<1x128xf32>,
    %c0_65 = arith.constant 0 : index
    %c0_66 = arith.constant 0 : index
    %64 = vector.load %arg4[%c0_65, %c0_66] : memref<2x1024xf32, #tpu.memory_space<vmem>>, vector<2x1024xf32>
    %c0_67 = arith.constant 0 : index
    %c0_68 = arith.constant 0 : index
    %65 = vector.load %arg2[%c0_67, %c0_68] : memref<2x1024xf32, #tpu.memory_space<vmem>>, vector<2x1024xf32>
    %66 = arith.addf %64, %65 : vector<2x1024xf32>
    %c0_69 = arith.constant 0 : index
    %c0_70 = arith.constant 0 : index
    %67 = vector.load %arg3[%c0_69, %c0_70] : memref<2x1024xf32, #tpu.memory_space<vmem>>, vector<2x1024xf32>
    tpu.vector_store %arg3[%c0_69, %c0_70], %66 {strides = array<i32>} : memref<2x1024xf32, #tpu.memory_space<vmem>>, vector<2x1024xf32>,
    return
  }
}

</mosaic_0001>

<bundles_post_ra>
// kernel: tpu_custom_call.1
= control target key start
LH: loop header
LB: loop body
LE: loop exit
PB: predicated region body
PF: predicated region fallthrough
CT: control target
= control target key end

     0   :  { %8 = vsyncpa [#allocation6], 0  ;;  %s300_s0 = inlined_call_operand.vmem [shape: s32[2,8], index: 0, kind: input, shape index: {}]   ;;  %s301_s1 = inlined_call_operand.vmem [shape: f32[16,128], index: 1, kind: input, shape index: {}]   ;;  %s302_s2 = inlined_call_operand.hbm [shape: f32[2,1024], index: 2, kind: input, shape index: {}, may-alias: {2,3}]   ;;  %s303_s3 = inlined_call_operand.hbm [shape: f32[2,1024], index: 3, kind: output, shape index: {}, may-alias: {2,3}]  }
   0x1   :  { %9 = vsyncpa [#allocation4], 0 }
   0x2   :  { %10 = vsyncpa [#allocation5], 0  ;;  %s17_s14 = sshll.u32 %s300_s0, 4  ;;  %s18_s14 = int_to_ptr.vmem [resolvable:$true] %s17_s14 }
   0x3   :  { %s162_s15 = scalar_lea.vmem %s18_s14, 32  ;;  %p167_p1 = scmp.lt.s32.totalorder %s18_s14, %s18_s14 }
   0x4   :  { %p163_p0 = scmp.ne.s32.totalorder %s18_s14, %s162_s15  ;;  %p168_p2 = scmp.lt.s32.totalorder %s162_s15, %s162_s15 }
   0x6   :  { %p169_p3 = por %p168_p2, %p167_p1 }
   0x8   :  { %p170_p4 = pnand %p169_p3, %p163_p0 }
   0xa   :  { %173 = shalt.err (!%p170_p4)
}
   0xb   :  { %s220_s16 = smov [#allocation3]   ;;  %s221_s17 = smov [#allocation7]  }
   0xc   :  { %20 = dma.vmem_to_smem %s18_s14, 32, %s220_s16, [#allocation6]  }
   0xd   :  { %s29_s18 = sshll.u32 %s221_s17, 4  ;;  %s30_s18 = int_to_ptr.vmem [resolvable:$true] %s29_s18 }
   0xe   :  { %s182_s19 = scalar_lea.vmem %s30_s18, 256  ;;  %p187_p6 = scmp.lt.s32.totalorder %s30_s18, %s30_s18 }
   0xf   :  { %p183_p5 = scmp.ne.s32.totalorder %s30_s18, %s182_s19  ;;  %p188_p7 = scmp.lt.s32.totalorder %s182_s19, %s182_s19 }
  0x11   :  { %p189_p8 = por %p188_p7, %p187_p6 }
  0x13   :  { %p190_p9 = pnand %p189_p8, %p183_p5 }
  0x15   :  { %193 = shalt.err (!%p190_p9)
}
  0x16   :  { %32 = dma.hbm_to_vmem [thread:$0]  %s302_s2, 256, %s30_s18, [#allocation4]  }
  0x17   :  { %214 = dma.done.wait [#allocation6], 32  }
  0x18   :  { %215 = vsyncadd [#allocation6], 4294967264 }
  0x19   :  { %216 = dma.done.wait [#allocation4], 256  }
  0x1a   :  { %217 = vsyncadd [#allocation4], 4294967040 }
  0x1b   :  { %39 = sfence }
  0x1c   :  { %s40_s21 = sld [smem:[#allocation3]]  ;;  %v106_v16 = vld [vmem:[#allocation7] sm:$0xff]  ;;  %v107_v19 = vld [vmem:[#allocation7 + $0x8] sm:$0xff] }
  0x1d   :  { %s144_s22 = sld [smem:[#allocation3 + $0x1]] }
  0x1e   :  { %s145_s23 = sld [smem:[#allocation3 + $0x2]] }
  0x1f   :  { %s146_s24 = sld [smem:[#allocation3 + $0x3]] }
  0x20   :  { %s147_s25 = sld [smem:[#allocation3 + $0x4]] }
  0x21   :  { %s148_s26 = sld [smem:[#allocation3 + $0x5]] }
  0x22   :  { %s41_s29 = scalar_lea.vmem %s301_s1, %s40_s21  ;;  %s149_s30 = sld [smem:[#allocation3 + $0x6]] }
  0x23   :  { %v42_v0 = vld [vmem:[%s41_s29] sm:$0x1]  ;;  %s45_s2 = scalar_lea.vmem %s301_s1, %s144_s22  ;;  %s150_s6 = sld [smem:[#allocation3 + $0x7]] }
  0x24   :  { %43 = vst [vmem:[#allocation2] sm:$0x1] %v42_v0  ;;  %v46_v1 = vld [vmem:[%s45_s2] sm:$0x1]  ;;  %s49_s9 = scalar_lea.vmem %s301_s1, %s145_s23  ;;  %s151_s10 = sld [smem:[#allocation3 + $0x80]] }
  0x25   :  { %47 = vst [vmem:[#allocation2 + $0x2] sm:$0x1] %v46_v1  ;;  %v50_v2 = vld [vmem:[%s49_s9] sm:$0x1]  ;;  %s53_s13 = scalar_lea.vmem %s301_s1, %s146_s24  ;;  %s152_s14 = sld [smem:[#allocation3 + $0x81]] }
  0x26   :  { %51 = vst [vmem:[#allocation2 + $0x4] sm:$0x1] %v50_v2  ;;  %v54_v3 = vld [vmem:[%s53_s13] sm:$0x1]  ;;  %s57_s17 = scalar_lea.vmem %s301_s1, %s147_s25  ;;  %s153_s18 = sld [smem:[#allocation3 + $0x82]] }
  0x27   :  { %55 = vst [vmem:[#allocation2 + $0x6] sm:$0x1] %v54_v3  ;;  %v58_v4 = vld [vmem:[%s57_s17] sm:$0x1]  ;;  %s61_s20 = scalar_lea.vmem %s301_s1, %s148_s26  ;;  %s154_s21 = sld [smem:[#allocation3 + $0x83]] }
  0x28   :  { %59 = vst [vmem:[#allocation2 + $0x8] sm:$0x1] %v58_v4  ;;  %v62_v5 = vld [vmem:[%s61_s20] sm:$0x1]  ;;  %s65_s24 = scalar_lea.vmem %s301_s1, %s149_s30  ;;  %s155_s27 = sld [smem:[#allocation3 + $0x84]] }
  0x29   :  { %63 = vst [vmem:[#allocation2 + $0xa] sm:$0x1] %v62_v5  ;;  %v66_v6 = vld [vmem:[%s65_s24] sm:$0x1]  ;;  %s69_s25 = scalar_lea.vmem %s301_s1, %s150_s6  ;;  %s156_s4 = sld [smem:[#allocation3 + $0x85]] }
  0x2a   :  { %67 = vst [vmem:[#allocation2 + $0xc] sm:$0x1] %v66_v6  ;;  %v70_v7 = vld [vmem:[%s69_s25] sm:$0x1]  ;;  %s73_s26 = scalar_lea.vmem %s301_s1, %s151_s10  ;;  %s157_s7 = sld [smem:[#allocation3 + $0x86]] }
  0x2b   :  { %71 = vst [vmem:[#allocation2 + $0xe] sm:$0x1] %v70_v7  ;;  %v74_v8 = vld [vmem:[%s73_s26] sm:$0x1]  ;;  %s77_s30 = scalar_lea.vmem %s301_s1, %s152_s14  ;;  %s158_s11 = sld [smem:[#allocation3 + $0x87]] }
  0x2c   :  { %75 = vst [vmem:[#allocation2 + $0x1] sm:$0x1] %v74_v8  ;;  %v78_v9 = vld [vmem:[%s77_s30] sm:$0x1]  ;;  %s81_s6 = scalar_lea.vmem %s301_s1, %s153_s18 }
  0x2d   :  { %79 = vst [vmem:[#allocation2 + $0x3] sm:$0x1] %v78_v9  ;;  %v82_v10 = vld [vmem:[%s81_s6] sm:$0x1]  ;;  %s85_s10 = scalar_lea.vmem %s301_s1, %s154_s21 }
  0x2e   :  { %83 = vst [vmem:[#allocation2 + $0x5] sm:$0x1] %v82_v10  ;;  %v86_v11 = vld [vmem:[%s85_s10] sm:$0x1]  ;;  %s89_s0 = scalar_lea.vmem %s301_s1, %s155_s27  ;;  %s222_s27 = smov [#allocation8]  }
  0x2f   :  { %87 = vst [vmem:[#allocation2 + $0x7] sm:$0x1] %v86_v11  ;;  %v90_v12 = vld [vmem:[%s89_s0] sm:$0x1]  ;;  %s93_s22 = scalar_lea.vmem %s301_s1, %s156_s4  ;;  %s118_s25 = sshll.u32 %s222_s27, 4  ;;  %s119_s25 = int_to_ptr.vmem [resolvable:$true] %s118_s25 }
  0x30   :  { %91 = vst [vmem:[#allocation2 + $0x9] sm:$0x1] %v90_v12  ;;  %v94_v13 = vld [vmem:[%s93_s22] sm:$0x1]  ;;  %s97_s24 = scalar_lea.vmem %s301_s1, %s157_s7  ;;  %s194_s4 = scalar_lea.vmem %s119_s25, 256 }
  0x31   :  { %95 = vst [vmem:[#allocation2 + $0xb] sm:$0x1] %v94_v13  ;;  %v98_v14 = vld [vmem:[%s97_s24] sm:$0x1]  ;;  %s101_s29 = scalar_lea.vmem %s301_s1, %s158_s11  ;;  %p195_p10 = scmp.ne.s32.totalorder %s119_s25, %s194_s4 }
  0x32   :  { %99 = vst [vmem:[#allocation2 + $0xd] sm:$0x1] %v98_v14  ;;  %v102_v15 = vld [vmem:[%s101_s29] sm:$0x1]  ;;  %p199_p11 = scmp.lt.s32.totalorder %s119_s25, %s119_s25  ;;  %p200_p12 = scmp.lt.s32.totalorder %s194_s4, %s194_s4 }
  0x33   :  { %103 = vst [vmem:[#allocation2 + $0xf] sm:$0x1] %v102_v15 }
  0x34   :  { %p201_p13 = por %p200_p12, %p199_p11 }
  0x36   :  { %v104_v17 = vld [vmem:[#allocation2] sm:$0xff]  ;;  %p202_p0 = pnand %p201_p13, %p195_p10 }
  0x37   :  { %v108_v18 = vadd.f32 %v106_v16, %v104_v17 }
  0x39   :  { %110 = vst [vmem:[#allocation8] sm:$0xff] %v108_v18 }
  0x3a   :  { %v105_v20 = vld [vmem:[#allocation2 + $0x8] sm:$0xff] }
  0x3b   :  { %v109_v21 = vadd.f32 %v107_v19, %v105_v20 }
  0x3d   :  { %111 = vst [vmem:[#allocation8 + $0x8] sm:$0xff] %v109_v21 }
  0x3e   :  { %205 = shalt.err (!%p202_p0)
}
  0x3f   :  { %121 = dma.vmem_to_hbm [thread:$0]  %s119_s25, 256, %s303_s3, [#allocation5]  }
  0x40   :  { %218 = dma.done.wait [#allocation5], 256  }
  0x41   :  { %219 = vsyncadd [#allocation5], 4294967040 }
  0x42   :  { %125 = vsyncpa [#allocation4], 1 }
  0x43   :  { %126 = vsyncpa [#allocation5], 1 }
  0x44   :  { %127 = vsyncpa [#allocation6], 1 }

</bundles_post_ra>
